<compile_context>
chip_gen: v6e
topology: v6e:2x2x1
jax: 0.10.0
libtpu: 0.0.40
codegen_flags: <defaults>
</compile_context>

<pallas_src>
import math

import jax
import jax.numpy as jnp
from jax.experimental import pallas as pl
from jax.experimental.pallas import tpu as pltpu

# Walker2d-v3 defaults (gym env parameters); deterministic, set in-script.
CTRL_COST_WEIGHT = 1e-3
FORWARD_REWARD_WEIGHT = 1.0
HEALTHY_REWARD = 1.0
TERMINATE_WHEN_UNHEALTHY = True
HEALTHY_Z_RANGE = (0.8, 2.0)
HEALTHY_ANGLE_RANGE = (-1.0, 1.0)
DELTA_T = 0.008

# Walker2d-v3 with exclude_current_positions_from_observation=False
# (asserted by the torch module: x position must be at state[..., 0]).
OBS_DIM = 18
ACT_DIM = 6

# Batch tile on the lane axis. Multiple of 128; double-buffered tile set is well
# under 1 MiB, safe on v5e (16 MiB scoped default), v6e (32 MiB) and v7x (64 MiB VMEM).
DEFAULT_TILE_B = 2048


def _round_up(x: int, m: int) -> int:
    return ((x + m - 1) // m) * m


def _make_kernel(terminate_when_unhealthy: bool):
    dt_inv = float(1.0 / DELTA_T)
    min_z, max_z = HEALTHY_Z_RANGE
    min_a, max_a = HEALTHY_ANGLE_RANGE

    def kernel(state_x_ref, next_xza_ref, action_ref, out_ref):
        # All refs are feature-major: (features, TILE_B); batch lives on lanes.
        x_before = state_x_ref[0:1, :].astype(jnp.float32)       # (1, T)
        x_after = next_xza_ref[0:1, :].astype(jnp.float32)       # (1, T)
        x_velocity = (x_after - x_before) * dt_inv
        forward_reward = FORWARD_REWARD_WEIGHT * x_velocity

        act = action_ref[...].astype(jnp.float32)                 # (ACT_DIM, T)
        # Cross-sublane reduce on the VPU/XLU (do NOT push this to the MXU).
        ctrl_cost = CTRL_COST_WEIGHT * jnp.sum(act * act, axis=0, keepdims=True)

        if terminate_when_unhealthy:
            healthy_reward = HEALTHY_REWARD                       # constant bonus
        else:
            z = next_xza_ref[1:2, :].astype(jnp.float32)
            angle = next_xza_ref[2:3, :].astype(jnp.float32)
            is_healthy = ((min_z < z) & (z < max_z)
                          & (min_a < angle) & (angle < max_a))
            healthy_reward = jnp.where(is_healthy, HEALTHY_REWARD, 0.0)

        out_ref[...] = forward_reward + healthy_reward - ctrl_cost

    return kernel


def walker2d_reward(state, action, next_state, *,
                    terminate_when_unhealthy: bool = TERMINATE_WHEN_UNHEALTHY,
                    tile_b: int = DEFAULT_TILE_B):
    """Pallas-backed Walker2d-v3 reward. All but the last dim are batch dims."""
    batch_shape = state.shape[:-1]
    obs_dim = state.shape[-1]
    act_dim = action.shape[-1]
    assert obs_dim >= 3, (
        "Need x position (and z/angle) in the observation "
        "(exclude_current_positions_from_observation must be False)")

    b = math.prod(batch_shape)

    s2 = state.reshape(b, obs_dim)
    a2 = action.reshape(b, act_dim)
    ns2 = next_state.reshape(b, obs_dim)

    # Layout plumbing only (no compute hoisted into the wrapper): slice the
    # columns the reward needs and flip to feature-major so kernel tiles are
    # lane-dense and only ~32 B/row of data crosses HBM into the kernel.
    state_x = s2[:, 0:1].T          # (1, b)      x position
    next_xza = ns2[:, 0:3].T        # (3, b)      x, z, angle
    act_t = a2.T                    # (act_dim, b)

    tile = min(tile_b, _round_up(b, 128))
    b_pad = _round_up(b, tile)
    if b_pad != b:
        pad = ((0, 0), (0, b_pad - b))
        state_x = jnp.pad(state_x, pad)
        next_xza = jnp.pad(next_xza, pad)
        act_t = jnp.pad(act_t, pad)

    grid = (b_pad // tile,)

    out = pl.pallas_call(
        _make_kernel(terminate_when_unhealthy),
        grid=grid,
        in_specs=[
            pl.BlockSpec((1, tile), lambda i: (0, i)),
            pl.BlockSpec((3, tile), lambda i: (0, i)),
            pl.BlockSpec((act_dim, tile), lambda i: (0, i)),
        ],
        out_specs=pl.BlockSpec((1, tile), lambda i: (0, i)),
        out_shape=jax.ShapeDtypeStruct((1, b_pad), jnp.float32),
        compiler_params=pltpu.CompilerParams(
            dimension_semantics=("parallel",)),
    )(state_x, next_xza, act_t)

    return out[0, :b].reshape(batch_shape)


def _reference_reward(state, action, next_state,
                      terminate_when_unhealthy=TERMINATE_WHEN_UNHEALTHY):
    ctrl_cost = CTRL_COST_WEIGHT * jnp.sum(jnp.square(action), axis=-1)
    x_velocity = (next_state[..., 0] - state[..., 0]) / DELTA_T
    forward_reward = FORWARD_REWARD_WEIGHT * x_velocity
    healthy_reward = jnp.full_like(ctrl_cost, HEALTHY_REWARD)
    if not terminate_when_unhealthy:
        z, angle = next_state[..., 1], next_state[..., 2]
        healthy = ((HEALTHY_Z_RANGE[0] < z) & (z < HEALTHY_Z_RANGE[1])
                   & (HEALTHY_ANGLE_RANGE[0] < angle)
                   & (angle < HEALTHY_ANGLE_RANGE[1]))
        healthy_reward = jnp.where(healthy, healthy_reward,
                                   jnp.zeros_like(healthy_reward))
    return forward_reward + healthy_reward - ctrl_cost


if __name__ == "__main__":
    key = jax.random.PRNGKey(0)
    k1, k2, k3, k4, k5 = jax.random.split(key, 5)

    batch = 8
    state = jax.random.normal(k1, (batch, OBS_DIM), dtype=jnp.float32)
    action = jax.random.normal(k2, (batch, ACT_DIM), dtype=jnp.float32)
    next_state = jax.random.normal(k3, (batch, OBS_DIM), dtype=jnp.float32)
    # Make z / angle span both healthy and unhealthy ranges so the gated branch
    # (terminate_when_unhealthy=False) is actually exercised.
    next_state = next_state.at[:, 1].set(
        jax.random.uniform(k4, (batch,), minval=0.5, maxval=2.3))
    next_state = next_state.at[:, 2].set(
        jax.random.uniform(k5, (batch,), minval=-1.3, maxval=1.3))

    # Default Walker2d-v3 config: terminate_when_unhealthy=True (constant bonus).
    reward = walker2d_reward(state, action, next_state)
    jax.block_until_ready(reward)
    ref = _reference_reward(state, action, next_state)
    assert reward.shape == (batch,), reward.shape
    assert jnp.allclose(reward, ref, atol=1e-4, rtol=1e-5), (reward, ref)

    # Non-default branch: healthy reward gated on is_healthy(next_state).
    reward_g = walker2d_reward(state, action, next_state,
                               terminate_when_unhealthy=False)
    jax.block_until_ready(reward_g)
    ref_g = _reference_reward(state, action, next_state,
                              terminate_when_unhealthy=False)
    assert jnp.allclose(reward_g, ref_g, atol=1e-4, rtol=1e-5), (reward_g, ref_g)

    # Multi-dimensional batch shapes are supported like the torch module.
    reward_md = walker2d_reward(state.reshape(2, 4, OBS_DIM),
                                action.reshape(2, 4, ACT_DIM),
                                next_state.reshape(2, 4, OBS_DIM))
    jax.block_until_ready(reward_md)
    assert reward_md.shape == (2, 4), reward_md.shape
    assert jnp.allclose(reward_md.reshape(-1), ref, atol=1e-4, rtol=1e-5)

    print("KERNEL_OK")
</pallas_src>

<mosaic_0001>
module attributes {stable_mosaic.version = 11 : i64} {
  func.func @kernel(%arg0: i32, %arg1: memref<1x128xf32, #tpu.memory_space<vmem>>, %arg2: memref<3x128xf32, #tpu.memory_space<vmem>>, %arg3: memref<6x128xf32, #tpu.memory_space<vmem>>, %arg4: memref<1x128xf32, #tpu.memory_space<vmem>>) attributes {dimension_semantics = [#tpu.dimension_semantics<parallel>], iteration_bounds = array<i64: 1>, scalar_prefetch = 0 : i64, scratch_operands = 0 : i64, tpu.core_type = #tpu.core_type<tc>, window_params = [{transform_indices = @transform_0, window_bounds = array<i64: 1, 128>}, {transform_indices = @transform_1, window_bounds = array<i64: 3, 128>}, {transform_indices = @transform_2, window_bounds = array<i64: 6, 128>}, {transform_indices = @transform_3, window_bounds = array<i64: 1, 128>}]} {
    %c0 = arith.constant 0 : index
    %c0_0 = arith.constant 0 : index
    %0 = vector.load %arg1[%c0, %c0_0] : memref<1x128xf32, #tpu.memory_space<vmem>>, vector<1x128xf32>
    %c0_1 = arith.constant 0 : index
    %c0_2 = arith.constant 0 : index
    %1 = vector.load %arg2[%c0_1, %c0_2] : memref<3x128xf32, #tpu.memory_space<vmem>>, vector<1x128xf32>
    %2 = arith.subf %1, %0 : vector<1x128xf32>
    %cst = arith.constant 1.250000e+02 : f32
    %3 = vector.broadcast %cst : f32 to vector<1x128xf32>
    %4 = arith.mulf %2, %3 : vector<1x128xf32>
    %cst_3 = arith.constant 1.000000e+00 : f32
    %5 = vector.broadcast %cst_3 : f32 to vector<1x128xf32>
    %6 = arith.mulf %5, %4 : vector<1x128xf32>
    %c0_4 = arith.constant 0 : index
    %c0_5 = arith.constant 0 : index
    %7 = vector.load %arg3[%c0_4, %c0_5] : memref<6x128xf32, #tpu.memory_space<vmem>>, vector<6x128xf32>
    %8 = arith.mulf %7, %7 : vector<6x128xf32>
    %cst_6 = arith.constant dense<0.000000e+00> : vector<128xf32>
    %9 = vector.multi_reduction <add>, %8, %cst_6 [0] : vector<6x128xf32> to vector<128xf32>
    %10 = vector.shape_cast %9 : vector<128xf32> to vector<1x128xf32>
    %cst_7 = arith.constant 1.000000e-03 : f32
    %11 = vector.broadcast %cst_7 : f32 to vector<1x128xf32>
    %12 = arith.mulf %11, %10 : vector<1x128xf32>
    %cst_8 = arith.constant 1.000000e+00 : f32
    %13 = vector.broadcast %cst_8 : f32 to vector<1x128xf32>
    %14 = arith.addf %6, %13 : vector<1x128xf32>
    %15 = arith.subf %14, %12 : vector<1x128xf32>
    %c0_9 = arith.constant 0 : index
    %c0_10 = arith.constant 0 : index
    %16 = vector.load %arg4[%c0_9, %c0_10] : memref<1x128xf32, #tpu.memory_space<vmem>>, vector<1x128xf32>
    tpu.vector_store %arg4[%c0_9, %c0_10], %15 {strides = array<i32>} : memref<1x128xf32, #tpu.memory_space<vmem>>, vector<1x128xf32>,
    return
  }
  func.func @transform_0(%arg0: i32) -> (i32, i32) {
    %c0_i32 = arith.constant 0 : i32
    %c0_i32_0 = arith.constant 0 : i32
    return %c0_i32, %arg0 : i32, i32
  }
  func.func @transform_1(%arg0: i32) -> (i32, i32) {
    %c0_i32 = arith.constant 0 : i32
    %c0_i32_0 = arith.constant 0 : i32
    return %c0_i32, %arg0 : i32, i32
  }
  func.func @transform_2(%arg0: i32) -> (i32, i32) {
    %c0_i32 = arith.constant 0 : i32
    %c0_i32_0 = arith.constant 0 : i32
    return %c0_i32, %arg0 : i32, i32
  }
  func.func @transform_3(%arg0: i32) -> (i32, i32) {
    %c0_i32 = arith.constant 0 : i32
    %c0_i32_0 = arith.constant 0 : i32
    return %c0_i32, %arg0 : i32, i32
  }
}

</mosaic_0001>

<bundles_post_ra>
// kernel: tpu_custom_call.1
= control target key start
LH: loop header
LB: loop body
LE: loop exit
PB: predicated region body
PF: predicated region fallthrough
CT: control target
= control target key end

     0   :  { %8 = vsyncpa [#allocation3], 0  ;;  %s210_s0 = inlined_call_operand.hbm [shape: f32[1,128], index: 0, kind: input, shape index: {}]   ;;  %s211_s1 = inlined_call_operand.hbm [shape: f32[3,128], index: 1, kind: input, shape index: {}]   ;;  %s212_s2 = inlined_call_operand.hbm [shape: f32[6,128], index: 2, kind: input, shape index: {}]   ;;  %s213_s3 = inlined_call_operand.hbm [shape: f32[1,128], index: 3, kind: output, shape index: {}]  }
   0x1   :  { %9 = vsyncpa [#allocation6], 0 }
   0x2   :  { %10 = vsyncpa [#allocation4], 0  ;;  %s174_s12 = smov [#allocation5]   ;;  %s175_s14 = smov [#allocation2]  }
   0x3   :  { %s27_s13 = sshll.u32 %s174_s12, 4  ;;  %s17_s15 = sshll.u32 %s175_s14, 4  ;;  %s28_s13 = int_to_ptr.vmem [resolvable:$true] %s27_s13  ;;  %s18_s15 = int_to_ptr.vmem [resolvable:$true] %s17_s15 }
   0x4   :  { %s96_s16 = scalar_lea.vmem %s28_s13, 64  ;;  %p101_p1 = scmp.lt.s32.totalorder %s28_s13, %s28_s13 }
   0x5   :  { %p97_p0 = scmp.ne.s32.totalorder %s28_s13, %s96_s16  ;;  %p102_p2 = scmp.lt.s32.totalorder %s96_s16, %s96_s16 }
   0x7   :  { %p103_p3 = por %p102_p2, %p101_p1 }
   0x9   :  { %p104_p4 = pnand %p103_p3, %p97_p0 }
   0xb   :  { %107 = shalt.err (!%p104_p4)
}
   0xc   :  { %30 = dma.hbm_to_vmem [thread:$0]  %s211_s1, 64, %s28_s13, [#allocation6]  }
   0xd   :  { %s116_s19 = scalar_lea.vmem %s18_s15, 16  ;;  %s120_s20 = scalar_lea.vmem %s18_s15, 32 }
   0xe   :  { %p117_p5 = scmp.ne.s32.totalorder %s18_s15, %s116_s19  ;;  %p121_p6 = scmp.lt.s32.totalorder %s18_s15, %s18_s15 }
   0xf   :  { %p122_p7 = scmp.lt.s32.totalorder %s120_s20, %s116_s19 }
  0x11   :  { %p123_p8 = por %p122_p7, %p121_p6 }
  0x13   :  { %p124_p9 = pnand %p123_p8, %p117_p5 }
  0x15   :  { %127 = shalt.err (!%p124_p9)
}
  0x16   :  { %20 = dma.hbm_to_vmem [thread:$0]  %s210_s0, 16, %s18_s15, [#allocation3]  }
  0x17   :  { %s176_s23 = smov [#allocation7]  }
  0x18   :  { %s37_s24 = sshll.u32 %s176_s23, 4  ;;  %s38_s24 = int_to_ptr.vmem [resolvable:$true] %s37_s24 }
  0x19   :  { %s136_s25 = scalar_lea.vmem %s38_s24, 128  ;;  %p141_p11 = scmp.lt.s32.totalorder %s38_s24, %s38_s24 }
  0x1a   :  { %p137_p10 = scmp.ne.s32.totalorder %s38_s24, %s136_s25  ;;  %p142_p12 = scmp.lt.s32.totalorder %s136_s25, %s136_s25 }
  0x1c   :  { %p143_p13 = por %p142_p12, %p141_p11 }
  0x1e   :  { %p144_p0 = pnand %p143_p13, %p137_p10 }
  0x20   :  { %147 = shalt.err (!%p144_p0)
}
  0x21   :  { %40 = dma.hbm_to_vmem [thread:$0]  %s212_s2, 128, %s38_s24, [#allocation6]  }
  0x22   :  { %168 = dma.done.wait [#allocation3], 16  }
  0x23   :  { %169 = vsyncadd [#allocation3], 4294967280 }
  0x24   :  { %170 = dma.done.wait [#allocation6], 192  }
  0x25   :  { %171 = vsyncadd [#allocation6], 4294967104  ;;  %v54_v0 = vld [vmem:[#allocation7] sm:$0x3f]  ;;  %vm56_vm0 = vcmask 1045504   ;;  %s177_s0 = smov [#allocation8]  }
  0x26   :  { %v55_v1 = vmul.f32 %v54_v0, %v54_v0  ;;  %v50_v2 = vld [vmem:[#allocation2] sm:$0x1]  ;;  %v51_v3 = vld [vmem:[#allocation5] sm:$0x1]  ;;  %s74_s2 = sshll.u32 %s177_s0, 4  ;;  %s75_s2 = int_to_ptr.vmem [resolvable:$true] %s74_s2 }
  0x27   :  { %v52_v6 = vsub.f32 %v51_v3, %v50_v2  ;;  %s148_s27 = scalar_lea.vmem %s75_s2, 16  ;;  %s152_s28 = scalar_lea.vmem %s75_s2, 32 }
  0x28   :  { %v57_v4 = vsel %vm56_vm0, %v55_v1, 0.0  ;;  %p149_p1 = scmp.ne.s32.totalorder %s75_s2, %s148_s27  ;;  %p153_p2 = scmp.lt.s32.totalorder %s75_s2, %s75_s2 }
  0x29   :  { %v58_v5 = vrot.slane %v57_v4, 4  ;;  %v53_v9 = vmul.f32 125.0, %v52_v6  ;;  %p154_p3 = scmp.lt.s32.totalorder %s152_s28, %s148_s27 }
  0x2b   :  { %v59_v7 = vadd.f32 %v58_v5, %v57_v4  ;;  %v65_v13 = vadd.f32 1.0, %v53_v9  ;;  %p155_p4 = por %p154_p3, %p153_p2 }
  0x2d   :  { %v60_v8 = vrot.slane %v59_v7, 2  ;;  %p156_p5 = pnand %p155_p4, %p149_p1 }
  0x2f   :  { %v61_v10 = vadd.f32 %v60_v8, %v59_v7 }
  0x31   :  { %v62_v11 = vrot.slane %v61_v10, 1 }
  0x33   :  { %v63_v12 = vadd.f32 %v62_v11, %v61_v10 }
  0x35   :  { %v64_v14 = vmul.f32 0.001, %v63_v12 }
  0x37   :  { %v66_v15 = vsub.f32 %v65_v13, %v64_v14 }
  0x39   :  { %67 = vst [vmem:[#allocation8] sm:$0x1] %v66_v15 }
  0x3a   :  { %159 = shalt.err (!%p156_p5)
}
  0x3b   :  { %77 = dma.vmem_to_hbm [thread:$0]  %s75_s2, 16, %s213_s3, [#allocation4]  }
  0x3c   :  { %172 = dma.done.wait [#allocation4], 16  }
  0x3d   :  { %173 = vsyncadd [#allocation4], 4294967280 }
  0x3e   :  { %81 = vsyncpa [#allocation3], 1 }
  0x3f   :  { %82 = vsyncpa [#allocation6], 1 }
  0x40   :  { %83 = vsyncpa [#allocation4], 1 }

</bundles_post_ra>
